<compile_context>
chip_gen: v7x
topology: tpu7x:2x2x1
jax: 0.10.0
libtpu: 0.0.40
codegen_flags: <defaults>
</compile_context>

<pallas_src>
import jax
import jax.numpy as jnp
from jax.experimental import pallas as pl
from jax.experimental.pallas import tpu as pltpu


def _round_up(x, m):
    return ((x + m - 1) // m) * m


def _patch_embed_kernel(x_ref, w_ref, b_ref, o_ref):
    # x_ref: (tm, K)  w_ref: (K, N)  b_ref: (1, N) f32  o_ref: (tm, N)
    acc = jnp.dot(x_ref[...], w_ref[...], preferred_element_type=jnp.float32)
    o_ref[...] = (acc + b_ref[...]).astype(o_ref.dtype)


def _choose_tile_m(M, target):
    """Row tile: multiple of 16 (bf16 sublane packing), preferably an exact
    divisor of M (skips the jnp.pad HBM pass), preferably yielding a grid of
    >= 2 steps so dual-TC chips (v7x) keep both cores fed."""
    m16 = _round_up(M, 16)
    target = max(16, min(_round_up(target, 16), m16))
    g_min = 2 if (m16 >= 2 * target or m16 >= 4096) else 1
    g0 = max(g_min, pl.cdiv(m16, target))
    if M % 16 == 0:
        # Look for an exact divisor tile of M near the target.
        for g in range(g0, min(g0 + 64, M // 16) + 1):
            if M % g == 0 and (M // g) % 16 == 0:
                return M // g
    # Fall back to a padded tiling.
    return min(target, _round_up(pl.cdiv(m16, g0), 16))


def patch_embed_matmul(x_mat, w_mat, bias, *, tm=2048, out_dtype=None,
                       x_buffers=2):
    """x_mat: (M, K), w_mat: (K, N), bias: (1, N) f32 -> (M, N) in out_dtype.

    N is the full output extent (may be < 128; full-extent block => masked
    stores, no pad/slice passes).  Weight/bias are grid-invariant and
    single-buffered; only X / output are pipelined.
    """
    M, K = x_mat.shape
    _, N = w_mat.shape
    out_dtype = out_dtype or x_mat.dtype

    tm = _choose_tile_m(M, tm)
    m_pad = _round_up(M, tm)
    if m_pad != M:
        # Rare: only when no 16-aligned divisor tile of M exists.
        x_mat = jnp.pad(x_mat, ((0, m_pad - M), (0, 0)))
    grid = (m_pad // tm,)

    in_itemsize = jnp.dtype(x_mat.dtype).itemsize
    out_itemsize = jnp.dtype(out_dtype).itemsize
    # VMEM footprint with physical lane padding (last dim occupies units of
    # 128 lanes): X (x_buffers deep) + W (single) + bias + out (double).
    k_lanes = _round_up(K, 128)
    n_lanes = _round_up(N, 128)
    vmem_bytes = (x_buffers * tm * k_lanes * in_itemsize
                  + k_lanes * n_lanes * in_itemsize
                  + n_lanes * 4
                  + 2 * tm * n_lanes * out_itemsize)
    # Capacity-derived cap (v7x: 64 MiB physical; v5e/v6e: 128 MiB), ~25%
    # headroom, so enlarging tm never requests more than the chip has.
    try:
        vmem_cap = pltpu.get_tpu_info().vmem_capacity_bytes
    except Exception:  # conservative default if the query is unavailable
        vmem_cap = 64 * 2**20
    vmem_limit = int(min(int(vmem_cap * 0.75),
                         max(2 * vmem_bytes, 16 * 2**20)))

    cost = pl.CostEstimate(
        flops=2 * m_pad * K * N,
        transcendentals=0,
        bytes_accessed=(m_pad * K * in_itemsize + K * N * in_itemsize
                        + N * 4 + m_pad * N * out_itemsize),
    )

    out = pl.pallas_call(
        _patch_embed_kernel,
        out_shape=jax.ShapeDtypeStruct((m_pad, N), out_dtype),
        grid_spec=pltpu.PrefetchScalarGridSpec(
            num_scalar_prefetch=0,
            grid=grid,
            in_specs=[
                pl.BlockSpec((tm, K), lambda i: (i, 0),
                             pipeline_mode=pl.Buffered(x_buffers)),
                # Grid-invariant weight/bias: a single VMEM copy each.
                pl.BlockSpec((K, N), lambda i: (0, 0),
                             pipeline_mode=pl.Buffered(1)),
                pl.BlockSpec((1, N), lambda i: (0, 0),
                             pipeline_mode=pl.Buffered(1)),
            ],
            out_specs=pl.BlockSpec((tm, N), lambda i: (i, 0)),
        ),
        compiler_params=pltpu.CompilerParams(
            dimension_semantics=("parallel",),
            vmem_limit_bytes=vmem_limit,
            # Allow XLA to fold the wrapper-side im2col transpose/cast into
            # the X operand instead of materializing an extra HBM copy.
            allow_input_fusion=[True, False, False],
        ),
        cost_estimate=cost,
    )(x_mat, w_mat, bias)
    return out[:M] if m_pad != M else out


def patch_embed_forward(x, conv_w, conv_b, patch_size, *,
                        compute_dtype=jnp.bfloat16, out_dtype=None,
                        tm=2048, x_buffers=2):
    """PatchEmbed.forward (norm_layer=None): Conv2d(k=s=patch) + flatten + T.

    x:       (B, C, H, W)            -- NCHW, like PyTorch
    conv_w:  (embed_dim, C, ph, pw)  -- nn.Conv2d weight layout
    conv_b:  (embed_dim,)
    returns: (B, Ho*Wo, embed_dim) in out_dtype (default: compute_dtype, i.e.
             bf16 -- keeps the dominant output stream narrow; pass
             out_dtype=jnp.float32 to match PyTorch's f32 output exactly).
    """
    B, C, H, W = x.shape
    ph, pw = patch_size
    # The module asserts H/W == img_size, so its F.pad branch is unreachable;
    # require divisibility directly.
    assert H % ph == 0 and W % pw == 0
    Ho, Wo = H // ph, W // pw
    embed_dim = conv_w.shape[0]
    K = C * ph * pw
    out_dtype = out_dtype or compute_dtype

    # TODO(synk): for tiny problems (a few MFLOP or less) a plain XLA conv is
    # cheaper than the pallas_call launch; add a size-based dispatch in prod.

    # --- im2col (wrapper side) ----------------------------------------------
    # TODO(synk): Option A of the review (4-D (1, C, k*ph, W) input block with
    # in-VMEM patch rearrange) would remove this pass entirely; kept as a
    # wrapper transpose with allow_input_fusion so XLA can fold it into the
    # kernel's X operand where possible.
    patches = x.reshape(B, C, Ho, ph, Wo, pw).transpose(0, 2, 4, 1, 3, 5)
    x_mat = patches.reshape(B * Ho * Wo, K).astype(compute_dtype)

    # Conv weight -> (K, N); K ordered (c, i, j) to match the patch layout.
    # N = embed_dim stays unpadded (full-extent output block, masked stores):
    # no pad + post-slice pass over the output.
    w_mat = conv_w.reshape(embed_dim, K).T.astype(compute_dtype)
    bias = conv_b.astype(jnp.float32).reshape(1, embed_dim)

    out = patch_embed_matmul(x_mat, w_mat, bias, tm=tm, out_dtype=out_dtype,
                             x_buffers=x_buffers)
    return out.reshape(B, Ho * Wo, embed_dim)


if __name__ == "__main__":
    # Small config consistent with the module: img_size=(16,16), patch_size=2,
    # in_chans=4, embed_dim=32, norm_layer=None.
    B, C, H, W = 2, 4, 16, 16
    patch_size = (2, 2)
    embed_dim = 32

    key = jax.random.PRNGKey(0)
    kx, kw, kb = jax.random.split(key, 3)
    x = jax.random.normal(kx, (B, C, H, W), dtype=jnp.float32)
    conv_w = (jax.random.normal(kw, (embed_dim, C, *patch_size),
                                dtype=jnp.float32) * 0.02)
    conv_b = jax.random.normal(kb, (embed_dim,), dtype=jnp.float32) * 0.01

    # Reference (nn.Conv2d stride=kernel + flatten(2).transpose(1, 2)).
    ref = jax.lax.conv_general_dilated(
        x, conv_w, window_strides=patch_size, padding="VALID",
        dimension_numbers=("NCHW", "OIHW", "NCHW"))
    ref = ref + conv_b[None, :, None, None]
    ref = ref.reshape(B, embed_dim, -1).transpose(0, 2, 1)

    n_patches = (H // patch_size[0]) * (W // patch_size[1])

    # f32 compute + f32 output: tight check against the conv reference.
    out_f32 = patch_embed_forward(x, conv_w, conv_b, patch_size,
                                  compute_dtype=jnp.float32,
                                  out_dtype=jnp.float32)
    out_f32 = jax.block_until_ready(out_f32)
    assert out_f32.shape == (B, n_patches, embed_dim)
    assert jnp.allclose(out_f32, ref, atol=1e-4, rtol=1e-4)

    # Default bf16 MXU path (f32 accumulate, bf16 output): loose tolerance.
    out_bf16 = patch_embed_forward(x, conv_w, conv_b, patch_size)
    out_bf16 = jax.block_until_ready(out_bf16)
    assert out_bf16.shape == (B, n_patches, embed_dim)
    assert out_bf16.dtype == jnp.bfloat16
    assert jnp.allclose(out_bf16.astype(jnp.float32), ref,
                        atol=1e-2, rtol=5e-2)

    print("KERNEL_OK")
</pallas_src>

<mosaic_0001>
module attributes {stable_mosaic.version = 11 : i64} {
  func.func @_patch_embed_kernel(%arg0: i32, %arg1: memref<128x16xf32, #tpu.memory_space<vmem>>, %arg2: memref<16x32xf32, #tpu.memory_space<vmem>>, %arg3: memref<1x32xf32, #tpu.memory_space<vmem>>, %arg4: memref<128x32xf32, #tpu.memory_space<vmem>>) attributes {dimension_semantics = [#tpu.dimension_semantics<parallel>], iteration_bounds = array<i64: 1>, scalar_prefetch = 0 : i64, scratch_operands = 0 : i64, tpu.core_type = #tpu.core_type<tc>, window_params = [{pipeline_mode = #tpu.pipeline_mode<double_buffered>, transform_indices = @transform_0, window_bounds = array<i64: 128, 16>}, {pipeline_mode = #tpu.pipeline_mode<synchronous>, transform_indices = @transform_1, window_bounds = array<i64: 16, 32>}, {pipeline_mode = #tpu.pipeline_mode<synchronous>, transform_indices = @transform_2, window_bounds = array<i64: 1, 32>}, {transform_indices = @transform_3, window_bounds = array<i64: 128, 32>}]} {
    %c0 = arith.constant 0 : index
    %c0_0 = arith.constant 0 : index
    %0 = vector.load %arg1[%c0, %c0_0] : memref<128x16xf32, #tpu.memory_space<vmem>>, vector<128x16xf32>
    %c0_1 = arith.constant 0 : index
    %c0_2 = arith.constant 0 : index
    %1 = vector.load %arg2[%c0_1, %c0_2] : memref<16x32xf32, #tpu.memory_space<vmem>>, vector<16x32xf32>
    %cst = arith.constant dense<0.000000e+00> : vector<128x32xf32>
    %2 = tpu.matmul %0, %1, %cst {dimension_numbers = #tpu.dot_dimension_numbers<[1], [0], [0], [1], [0, 0, 1, 1], [], []>} : vector<128x16xf32>, vector<16x32xf32>, vector<128x32xf32> -> vector<128x32xf32>
    %c0_3 = arith.constant 0 : index
    %c0_4 = arith.constant 0 : index
    %3 = vector.load %arg3[%c0_3, %c0_4] : memref<1x32xf32, #tpu.memory_space<vmem>>, vector<1x32xf32>
    %4 = vector.broadcast %3 : vector<1x32xf32> to vector<128x32xf32>
    %5 = arith.addf %2, %4 : vector<128x32xf32>
    %c0_5 = arith.constant 0 : index
    %c0_6 = arith.constant 0 : index
    %6 = vector.load %arg4[%c0_5, %c0_6] : memref<128x32xf32, #tpu.memory_space<vmem>>, vector<128x32xf32>
    tpu.vector_store %arg4[%c0_5, %c0_6], %5 {strides = array<i32>} : memref<128x32xf32, #tpu.memory_space<vmem>>, vector<128x32xf32>,
    return
  }
  func.func @transform_0(%arg0: i32) -> (i32, i32) {
    %c0_i32 = arith.constant 0 : i32
    %c0_i32_0 = arith.constant 0 : i32
    return %arg0, %c0_i32 : i32, i32
  }
  func.func @transform_1(%arg0: i32) -> (i32, i32) {
    %c0_i32 = arith.constant 0 : i32
    %c0_i32_0 = arith.constant 0 : i32
    %c0_i32_1 = arith.constant 0 : i32
    return %c0_i32, %c0_i32_0 : i32, i32
  }
  func.func @transform_2(%arg0: i32) -> (i32, i32) {
    %c0_i32 = arith.constant 0 : i32
    %c0_i32_0 = arith.constant 0 : i32
    %c0_i32_1 = arith.constant 0 : i32
    return %c0_i32, %c0_i32_0 : i32, i32
  }
  func.func @transform_3(%arg0: i32) -> (i32, i32) {
    %c0_i32 = arith.constant 0 : i32
    %c0_i32_0 = arith.constant 0 : i32
    return %arg0, %c0_i32 : i32, i32
  }
}

</mosaic_0001>

<bundles_post_ra>
// kernel: tpu_custom_call.1
= control target key start
LH: loop header
LB: loop body
LE: loop exit
PB: predicated region body
PF: predicated region fallthrough
CT: control target
= control target key end

     0   :  { %vm39_vm0 = vcmask 130048   ;;  %vm233_vm1 = vcmask 261120   ;;  %s480_s1 = inlined_call_operand.vmem [shape: f32[16,32], index: 1, kind: input, shape index: {}]   ;;  %s481_s0 = inlined_call_operand.vmem [shape: f32[128,16], index: 0, kind: input, shape index: {}]   ;;  %s482_s2 = inlined_call_operand.vmem [shape: f32[1,32], index: 2, kind: input, shape index: {}]   ;;  %s483_s3 = inlined_call_operand.vmem [shape: f32[128,32], index: 3, kind: output, shape index: {}]  }
   0x1   :  { %v30_v0 = vld [vmem:[%s480_s1] sm:$0xff]  ;;  %v31_v1 = vld [vmem:[%s480_s1 + $0x8] sm:$0xff]  ;;  %v16_v7 = vld [vmem:[%s481_s0 + $0x10] sm:$0xff] }
   0x2   :  { %v14_v2 = vld [vmem:[%s481_s0] sm:$0xff]  ;;  %v317_v3 = vpack.c.bf16 %v31_v1, %v30_v0  ;;  %v15_v5 = vld [vmem:[%s481_s0 + $0x8] sm:$0xff]  ;;  %v24_v8 = vld [vmem:[%s481_s0 + $0x50] sm:$0xff] }
   0x3   :  { %293 = vmatprep.mubr.msk.f32.mxu0 %vm39_vm0, %v14_v2  ;;  %v22_v4 = vld [vmem:[%s481_s0 + $0x40] sm:$0xff]  ;;  %v23_v6 = vld [vmem:[%s481_s0 + $0x48] sm:$0xff]  ;;  %v17_v9 = vld [vmem:[%s481_s0 + $0x18] sm:$0xff] }
   0x4   :  { %305 = vmatprep.mubr.msk.f32.mxu1 %vm39_vm0, %v22_v4  ;;  %318 = vmatprep.subr.bf16.mxu0 %v317_v3  ;;  %v25_v10 = vld [vmem:[%s481_s0 + $0x58] sm:$0xff]  ;;  %v18_v11 = vld [vmem:[%s481_s0 + $0x20] sm:$0xff]  ;;  %v19_v13 = vld [vmem:[%s481_s0 + $0x28] sm:$0xff] }
   0x5   :  { %321 = vmatprep.subr.bf16.mxu1 %v317_v3  ;;  %320 = vmatpush3.bf16.msra.mxu0 %v317_v3  ;;  %v26_v12 = vld [vmem:[%s481_s0 + $0x60] sm:$0xff]  ;;  %v27_v14 = vld [vmem:[%s481_s0 + $0x68] sm:$0xff]  ;;  %v20_v15 = vld [vmem:[%s481_s0 + $0x30] sm:$0xff] }
   0x6   :  { %322 = vmatpush3.bf16.msra.mxu1 %v317_v3  ;;  %v28_v16 = vld [vmem:[%s481_s0 + $0x70] sm:$0xff]  ;;  %v21_v17 = vld [vmem:[%s481_s0 + $0x38] sm:$0xff]  ;;  %v254_v19 = vld [vmem:[%s482_s2] ss:$0 sm:$0xff] }
   0x7   :  { %v29_v18 = vld [vmem:[%s481_s0 + $0x78] sm:$0xff] }
   0x8   :  { %294 = vmatmul.mubr.msk.f32.vlgmr.msra.gmra.mrb[0].mxu0 %vm39_vm0, %v15_v5 }
   0x9   :  { %306 = vmatmul.mubr.msk.f32.vlgmr.msra.gmra.mrb[0].mxu1 %vm39_vm0, %v23_v6  ;;  %296 = vmatprep.mubr.msk.f32.mxu0 %vm39_vm0, %v16_v7 }
   0xa   :  { %308 = vmatprep.mubr.msk.f32.mxu1 %vm39_vm0, %v24_v8 }
   0xc   :  { %297 = vmatmul.mubr.msk.f32.gmra.mrb[2].mxu0 %vm39_vm0, %v17_v9 }
   0xd   :  { %309 = vmatmul.mubr.msk.f32.gmra.mrb[2].mxu1 %vm39_vm0, %v25_v10  ;;  %299 = vmatprep.mubr.msk.f32.mxu0 %vm39_vm0, %v18_v11 }
   0xe   :  { %311 = vmatprep.mubr.msk.f32.mxu1 %vm39_vm0, %v26_v12 }
  0x10   :  { %300 = vmatmul.mubr.msk.f32.gmra.mrb[4].mxu0 %vm39_vm0, %v19_v13 }
  0x11   :  { %312 = vmatmul.mubr.msk.f32.gmra.mrb[4].mxu1 %vm39_vm0, %v27_v14  ;;  %302 = vmatprep.mubr.msk.f32.mxu0 %vm39_vm0, %v20_v15 }
  0x12   :  { %314 = vmatprep.mubr.msk.f32.mxu1 %vm39_vm0, %v28_v16 }
  0x14   :  { %303 = vmatmul.mubr.msk.f32.gmra.mrb[6].mxu0 %vm39_vm0, %v21_v17 }
  0x15   :  { %315 = vmatmul.mubr.msk.f32.gmra.mrb[6].mxu1 %vm39_vm0, %v29_v18 }
  0xdb   :  { %v295_v20 = vpop.f32.mrb[0].mxu0 }
  0xdc   :  { %v307_v21 = vpop.f32.mrb[0].mxu1  ;;  %v160_v22 = vadd.f32 %v295_v20, %v254_v19  ;;  %v154_v24 = vpop.f32.mrb[1].mxu0 }
  0xdd   :  { %v200_v23 = vadd.f32 %v307_v21, %v254_v19  ;;  %v194_v25 = vpop.f32.mrb[1].mxu1  ;;  %v155_v26 = vadd.f32 %v254_v19, %v154_v24 }
  0xde   :  { %v195_v27 = vadd.f32 %v254_v19, %v194_v25  ;;  %235 = vst.msk [vmem:[%s483_s3 + $0x8] sm:$0xff] %vm233_vm1, %v160_v22 }
  0xdf   :  { %243 = vst.msk [vmem:[%s483_s3 + $0x48] sm:$0xff] %vm233_vm1, %v200_v23  ;;  %234 = vst.msk [vmem:[%s483_s3] sm:$0xff] %vm233_vm1, %v155_v26  ;;  %v298_v28 = vpop.f32.mrb[2].mxu0 }
  0xe0   :  { %242 = vst.msk [vmem:[%s483_s3 + $0x40] sm:$0xff] %vm233_vm1, %v195_v27  ;;  %v310_v29 = vpop.f32.mrb[2].mxu1  ;;  %v170_v30 = vadd.f32 %v298_v28, %v254_v19  ;;  %v164_v32 = vpop.f32.mrb[3].mxu0 }
  0xe1   :  { %v210_v31 = vadd.f32 %v310_v29, %v254_v19  ;;  %v204_v33 = vpop.f32.mrb[3].mxu1  ;;  %v165_v34 = vadd.f32 %v254_v19, %v164_v32 }
  0xe2   :  { %v205_v35 = vadd.f32 %v254_v19, %v204_v33  ;;  %237 = vst.msk [vmem:[%s483_s3 + $0x18] sm:$0xff] %vm233_vm1, %v170_v30 }
  0xe3   :  { %245 = vst.msk [vmem:[%s483_s3 + $0x58] sm:$0xff] %vm233_vm1, %v210_v31  ;;  %236 = vst.msk [vmem:[%s483_s3 + $0x10] sm:$0xff] %vm233_vm1, %v165_v34  ;;  %v301_v36 = vpop.f32.mrb[4].mxu0 }
  0xe4   :  { %244 = vst.msk [vmem:[%s483_s3 + $0x50] sm:$0xff] %vm233_vm1, %v205_v35  ;;  %v313_v37 = vpop.f32.mrb[4].mxu1  ;;  %v180_v38 = vadd.f32 %v301_v36, %v254_v19  ;;  %v174_v40 = vpop.f32.mrb[5].mxu0 }
  0xe5   :  { %v220_v39 = vadd.f32 %v313_v37, %v254_v19  ;;  %v214_v41 = vpop.f32.mrb[5].mxu1  ;;  %v175_v42 = vadd.f32 %v254_v19, %v174_v40 }
  0xe6   :  { %v215_v43 = vadd.f32 %v254_v19, %v214_v41  ;;  %239 = vst.msk [vmem:[%s483_s3 + $0x28] sm:$0xff] %vm233_vm1, %v180_v38 }
  0xe7   :  { %247 = vst.msk [vmem:[%s483_s3 + $0x68] sm:$0xff] %vm233_vm1, %v220_v39  ;;  %238 = vst.msk [vmem:[%s483_s3 + $0x20] sm:$0xff] %vm233_vm1, %v175_v42  ;;  %v304_v44 = vpop.f32.mrb[6].mxu0 }
  0xe8   :  { %246 = vst.msk [vmem:[%s483_s3 + $0x60] sm:$0xff] %vm233_vm1, %v215_v43  ;;  %v316_v45 = vpop.f32.mrb[6].mxu1  ;;  %v190_v46 = vadd.f32 %v304_v44, %v254_v19  ;;  %v184_v48 = vpop.f32.mrb[7].mxu0 }
  0xe9   :  { %v230_v47 = vadd.f32 %v316_v45, %v254_v19  ;;  %v224_v49 = vpop.f32.mrb[7].mxu1  ;;  %v185_v50 = vadd.f32 %v254_v19, %v184_v48 }
  0xea   :  { %v225_v51 = vadd.f32 %v254_v19, %v224_v49  ;;  %241 = vst.msk [vmem:[%s483_s3 + $0x38] sm:$0xff] %vm233_vm1, %v190_v46 }
  0xeb   :  { %249 = vst.msk [vmem:[%s483_s3 + $0x78] sm:$0xff] %vm233_vm1, %v230_v47  ;;  %240 = vst.msk [vmem:[%s483_s3 + $0x30] sm:$0xff] %vm233_vm1, %v185_v50 }
  0xec   :  { %248 = vst.msk [vmem:[%s483_s3 + $0x70] sm:$0xff] %vm233_vm1, %v225_v51 }

</bundles_post_ra>
